<compile_context>
chip_gen: v5e
topology: v5e:2x2
jax: 0.10.0
libtpu: 0.0.40
codegen_flags: <defaults>
</compile_context>

<pallas_src>
import math

import jax
import jax.numpy as jnp
from jax.experimental import pallas as pl
from jax.experimental.pallas import tpu as pltpu


def _round_up(x, m):
    return ((x + m - 1) // m) * m


# --------------------------------------------------------------------------
# Kernel
# --------------------------------------------------------------------------
def _augru_kernel(x_ref, att_ref, h_ref, wx_ref, bx_ref, wh_ref, bh_ref,
                  out_ref):
    """One AUGRU cell step on a (bb, .) batch tile.

    x_ref:   (bb, I)      compute dtype
    att_ref: (bb, 1)      f32 attention score
    h_ref:   (bb, Hp)     compute dtype (lane-padded hidden state)
    wx_ref:  (I, 3*Hp)    fused [xu | xr | xg] weights (pre-transposed/padded)
    bx_ref:  (1, 3*Hp)    f32
    wh_ref:  (Hp, 3*Hp)   fused [hu | hr | hg] weights (pre-transposed/padded)
    bh_ref:  (1, 3*Hp)    f32
    out_ref: (bb, Hp)     h' (padded lanes come out as zero)
    """
    Hp = out_ref.shape[-1]

    x = x_ref[...]
    att = att_ref[...]
    h = h_ref[...]

    # Two fused MXU matmuls instead of six small Linear layers; f32 accumulate.
    gx = jnp.dot(x, wx_ref[...], preferred_element_type=jnp.float32) + bx_ref[...]
    gh = jnp.dot(h, wh_ref[...], preferred_element_type=jnp.float32) + bh_ref[...]

    def sigmoid(z):                       # exact, and only one EUP op (tanh)
        return 0.5 * (jnp.tanh(0.5 * z) + 1.0)

    # Gate slices are lane-aligned (Hp is a multiple of 128).
    u = sigmoid(gx[:, 0 * Hp:1 * Hp] + gh[:, 0 * Hp:1 * Hp]) * att
    r = sigmoid(gx[:, 1 * Hp:2 * Hp] + gh[:, 1 * Hp:2 * Hp])
    g = jnp.tanh(gx[:, 2 * Hp:3 * Hp] + r * gh[:, 2 * Hp:3 * Hp])

    h_f32 = h.astype(jnp.float32)
    out_ref[...] = ((1.0 - u) * h_f32 + u * g).astype(out_ref.dtype)


# --------------------------------------------------------------------------
# One-time parameter fusion (layout plumbing paid once, not per forward call)
# --------------------------------------------------------------------------
def fuse_params(params, input_size, hidden_size, compute_dtype=jnp.bfloat16):
    """Fuse the six Linear layers into two matmul operands (gate order u|r|g),
    pad every gate to a 128-lane stride and cast weights to the compute dtype.
    Padded weight rows/cols and bias lanes are zero so padded output lanes are
    exactly zero (sliced off by the wrapper)."""
    H = hidden_size
    I = input_size
    Hp = _round_up(H, 128)

    def fuse_w(names, fan_in, fan_in_pad):
        cols = []
        for n in names:
            w = params[n + "_w"].T.astype(jnp.float32)          # (fan_in, H)
            w = jnp.pad(w, ((0, fan_in_pad - fan_in), (0, Hp - H)))
            cols.append(w)
        return jnp.concatenate(cols, axis=1).astype(compute_dtype)

    def fuse_b(names):
        cols = [jnp.pad(params[n + "_b"].astype(jnp.float32), (0, Hp - H))
                for n in names]
        return jnp.concatenate(cols).reshape(1, 3 * Hp)

    return {
        "wx": fuse_w(("xu", "xr", "xg"), I, I),                  # (I,  3*Hp)
        "wh": fuse_w(("hu", "hr", "hg"), H, Hp),                 # (Hp, 3*Hp)
        "bx": fuse_b(("xu", "xr", "xg")),                        # (1,  3*Hp)
        "bh": fuse_b(("hu", "hr", "hg")),                        # (1,  3*Hp)
        "input_size": I,
        "hidden_size": H,
        "hidden_pad": Hp,
        "compute_dtype": compute_dtype,
    }


# --------------------------------------------------------------------------
# Tile / VMEM budgeting
# --------------------------------------------------------------------------
def _pick_tile_and_vmem(B, I, Hp, compute_itemsize, budget_bytes=48 << 20):
    """Pick a batch tile by bytes: double-buffered activations + weights plus
    the f32 projection temporaries must fit the budget (sized for v7x 64 MiB)."""
    # weights + biases, conservatively assumed double-buffered.
    w_bytes = 2 * ((I + Hp) * 3 * Hp * compute_itemsize + 2 * 3 * Hp * 4)
    bb_cap = _round_up(max(B, 1), 8)

    chosen = 8
    for bb in (1024, 512, 256, 128, 64, 32, 16, 8):
        if bb > bb_cap:
            continue
        act = bb * ((I + Hp) * compute_itemsize + 4 + Hp * 4)   # x, h, att, out
        tmp = 2 * bb * 3 * Hp * 4                               # gx, gh (f32)
        if 2 * act + tmp + w_bytes <= budget_bytes:
            chosen = bb
            break

    act = chosen * ((I + Hp) * compute_itemsize + 4 + Hp * 4)
    tmp = 2 * chosen * 3 * Hp * 4
    est = 2 * act + tmp + w_bytes + (2 << 20)
    vmem_limit = int(min(max(est, 16 << 20), 60 << 20))
    return chosen, vmem_limit


# --------------------------------------------------------------------------
# Wrapper
# --------------------------------------------------------------------------
def augru_cell_forward(inputs, h, fused):
    """inputs: (B, input_size + 1) — last column is the attention score.
    h: tuple of one (B, hidden_size) array.  fused: output of fuse_params."""
    (h,) = h
    B = inputs.shape[0]
    I = fused["input_size"]
    H = fused["hidden_size"]
    Hp = fused["hidden_pad"]
    cdt = fused["compute_dtype"]
    out_dtype = h.dtype

    # Split attention out (no lane-unaligned in-kernel slices of the packed
    # input); pad the hidden state to the 128-lane gate stride.
    x = inputs[:, :I].astype(cdt)
    att = inputs[:, I:I + 1].astype(jnp.float32)
    hp = h
    if Hp != H:
        hp = jnp.pad(h, ((0, 0), (0, Hp - H)))
    hp = hp.astype(cdt)

    itemsize = jnp.dtype(cdt).itemsize
    bb, vmem_limit = _pick_tile_and_vmem(B, I, Hp, itemsize)
    grid = (pl.cdiv(B, bb),)

    out = pl.pallas_call(
        _augru_kernel,
        out_shape=jax.ShapeDtypeStruct((B, Hp), out_dtype),
        grid=grid,
        in_specs=[
            pl.BlockSpec((bb, I), lambda i: (i, 0)),        # x tile
            pl.BlockSpec((bb, 1), lambda i: (i, 0)),        # attention tile
            pl.BlockSpec((bb, Hp), lambda i: (i, 0)),       # h tile
            pl.BlockSpec((I, 3 * Hp), lambda i: (0, 0)),    # fused x-weights
            pl.BlockSpec((1, 3 * Hp), lambda i: (0, 0)),    # fused x-bias
            pl.BlockSpec((Hp, 3 * Hp), lambda i: (0, 0)),   # fused h-weights
            pl.BlockSpec((1, 3 * Hp), lambda i: (0, 0)),    # fused h-bias
        ],
        out_specs=pl.BlockSpec((bb, Hp), lambda i: (i, 0)),
        compiler_params=pltpu.CompilerParams(
            dimension_semantics=("parallel",),
            vmem_limit_bytes=vmem_limit),
    )(x, att, hp, fused["wx"], fused["bx"], fused["wh"], fused["bh"])

    if Hp != H:
        out = out[:, :H]
    return (out,)


# --------------------------------------------------------------------------
# Init + pure-JAX reference (mirrors the PyTorch module)
# --------------------------------------------------------------------------
def init_params(key, input_size, hidden_size):
    """nn.Linear-style init for the six dense layers xu/hu/xr/hr/xg/hg."""
    names = ["xu", "hu", "xr", "hr", "xg", "hg"]
    keys = jax.random.split(key, 2 * len(names))
    params = {}
    for idx, name in enumerate(names):
        fan_in = input_size if name[0] == "x" else hidden_size
        k = 1.0 / math.sqrt(fan_in)
        params[name + "_w"] = jax.random.uniform(
            keys[2 * idx], (hidden_size, fan_in), jnp.float32, -k, k)
        params[name + "_b"] = jax.random.uniform(
            keys[2 * idx + 1], (hidden_size,), jnp.float32, -k, k)
    return params


def augru_cell_ref(inputs, h, params):
    """Pure-JAX reference mirroring the PyTorch forward."""
    (h,) = h
    x, att = inputs[:, :-1], inputs[:, -1:]

    def lin(name, v):
        return v @ params[name + "_w"].T + params[name + "_b"]

    u = jax.nn.sigmoid(lin("xu", x) + lin("hu", h)) * att
    r = jax.nn.sigmoid(lin("xr", x) + lin("hr", h))
    g = jnp.tanh(lin("xg", x) + r * lin("hg", h))
    return ((1.0 - u) * h + u * g,)


if __name__ == "__main__":
    B, I, H = 2, 4, 32   # batch, input_size, hidden_size

    key = jax.random.PRNGKey(0)
    kp, kx, kh = jax.random.split(key, 3)
    params = init_params(kp, I, H)
    inputs = jax.random.normal(kx, (B, I + 1), jnp.float32)  # last col = attention
    h0 = jax.random.normal(kh, (B, H), jnp.float32)

    (h_ref,) = augru_cell_ref(inputs, (h0,), params)

    # f32 compute path: tight check against the pure-JAX reference.
    fused_f32 = fuse_params(params, I, H, compute_dtype=jnp.float32)
    (h_f32,) = augru_cell_forward(inputs, (h0,), fused_f32)
    h_f32 = jax.block_until_ready(h_f32)
    assert h_f32.shape == (B, H), h_f32.shape
    assert bool(jnp.all(jnp.isfinite(h_f32)))
    err_f32 = float(jnp.max(jnp.abs(h_f32 - h_ref)))
    assert err_f32 < 1e-5, err_f32

    # bf16 compute path (default, halves HBM bytes): relaxed tolerance.
    fused_bf16 = fuse_params(params, I, H)  # compute_dtype=jnp.bfloat16
    (h_bf16,) = augru_cell_forward(inputs, (h0,), fused_bf16)
    h_bf16 = jax.block_until_ready(h_bf16)
    assert h_bf16.shape == (B, H), h_bf16.shape
    assert bool(jnp.all(jnp.isfinite(h_bf16)))
    err_bf16 = float(jnp.max(jnp.abs(h_bf16 - h_ref)))
    assert err_bf16 < 5e-2, err_bf16

    print("KERNEL_OK")
</pallas_src>

<mosaic_0001>
module attributes {stable_mosaic.version = 11 : i64} {
  func.func @_augru_kernel(%arg0: i32, %arg1: memref<8x4xf32, #tpu.memory_space<vmem>>, %arg2: memref<8x1xf32, #tpu.memory_space<vmem>>, %arg3: memref<8x128xf32, #tpu.memory_space<vmem>>, %arg4: memref<4x384xf32, #tpu.memory_space<vmem>>, %arg5: memref<1x384xf32, #tpu.memory_space<vmem>>, %arg6: memref<128x384xf32, #tpu.memory_space<vmem>>, %arg7: memref<1x384xf32, #tpu.memory_space<vmem>>, %arg8: memref<8x128xf32, #tpu.memory_space<vmem>>) attributes {dimension_semantics = [#tpu.dimension_semantics<parallel>], iteration_bounds = array<i64: 1>, scalar_prefetch = 0 : i64, scratch_operands = 0 : i64, tpu.core_type = #tpu.core_type<tc>, window_params = [{transform_indices = @transform_0, window_bounds = array<i64: 8, 4>}, {transform_indices = @transform_1, window_bounds = array<i64: 8, 1>}, {transform_indices = @transform_2, window_bounds = array<i64: 8, 128>}, {pipeline_mode = #tpu.pipeline_mode<synchronous>, transform_indices = @transform_3, window_bounds = array<i64: 4, 384>}, {pipeline_mode = #tpu.pipeline_mode<synchronous>, transform_indices = @transform_4, window_bounds = array<i64: 1, 384>}, {pipeline_mode = #tpu.pipeline_mode<synchronous>, transform_indices = @transform_5, window_bounds = array<i64: 128, 384>}, {pipeline_mode = #tpu.pipeline_mode<synchronous>, transform_indices = @transform_6, window_bounds = array<i64: 1, 384>}, {transform_indices = @transform_7, window_bounds = array<i64: 8, 128>}]} {
    %c0 = arith.constant 0 : index
    %c0_0 = arith.constant 0 : index
    %0 = vector.load %arg1[%c0, %c0_0] : memref<8x4xf32, #tpu.memory_space<vmem>>, vector<8x4xf32>
    %c0_1 = arith.constant 0 : index
    %c0_2 = arith.constant 0 : index
    %1 = vector.load %arg2[%c0_1, %c0_2] : memref<8x1xf32, #tpu.memory_space<vmem>>, vector<8x1xf32>
    %c0_3 = arith.constant 0 : index
    %c0_4 = arith.constant 0 : index
    %2 = vector.load %arg3[%c0_3, %c0_4] : memref<8x128xf32, #tpu.memory_space<vmem>>, vector<8x128xf32>
    %c0_5 = arith.constant 0 : index
    %c0_6 = arith.constant 0 : index
    %3 = vector.load %arg4[%c0_5, %c0_6] : memref<4x384xf32, #tpu.memory_space<vmem>>, vector<4x384xf32>
    %cst = arith.constant dense<0.000000e+00> : vector<8x384xf32>
    %4 = tpu.matmul %0, %3, %cst {dimension_numbers = #tpu.dot_dimension_numbers<[1], [0], [0], [1], [0, 0, 1, 1], [], []>} : vector<8x4xf32>, vector<4x384xf32>, vector<8x384xf32> -> vector<8x384xf32>
    %c0_7 = arith.constant 0 : index
    %c0_8 = arith.constant 0 : index
    %5 = vector.load %arg5[%c0_7, %c0_8] : memref<1x384xf32, #tpu.memory_space<vmem>>, vector<1x384xf32>
    %6 = vector.broadcast %5 : vector<1x384xf32> to vector<8x384xf32>
    %7 = arith.addf %4, %6 : vector<8x384xf32>
    %c0_9 = arith.constant 0 : index
    %c0_10 = arith.constant 0 : index
    %8 = vector.load %arg6[%c0_9, %c0_10] : memref<128x384xf32, #tpu.memory_space<vmem>>, vector<128x384xf32>
    %cst_11 = arith.constant dense<0.000000e+00> : vector<8x384xf32>
    %9 = tpu.matmul %2, %8, %cst_11 {dimension_numbers = #tpu.dot_dimension_numbers<[1], [0], [0], [1], [0, 0, 1, 1], [], []>} : vector<8x128xf32>, vector<128x384xf32>, vector<8x384xf32> -> vector<8x384xf32>
    %c0_12 = arith.constant 0 : index
    %c0_13 = arith.constant 0 : index
    %10 = vector.load %arg7[%c0_12, %c0_13] : memref<1x384xf32, #tpu.memory_space<vmem>>, vector<1x384xf32>
    %11 = vector.broadcast %10 : vector<1x384xf32> to vector<8x384xf32>
    %12 = arith.addf %9, %11 : vector<8x384xf32>
    %13 = vector.extract_strided_slice %7 {offsets = [0, 0], sizes = [8, 128], strides = [1, 1]} : vector<8x384xf32> to vector<8x128xf32>
    %14 = vector.extract_strided_slice %12 {offsets = [0, 0], sizes = [8, 128], strides = [1, 1]} : vector<8x384xf32> to vector<8x128xf32>
    %15 = arith.addf %13, %14 : vector<8x128xf32>
    %cst_14 = arith.constant 5.000000e-01 : f32
    %16 = vector.broadcast %cst_14 : f32 to vector<8x128xf32>
    %17 = arith.mulf %16, %15 : vector<8x128xf32>
    %18 = math.tanh %17 : vector<8x128xf32>
    %cst_15 = arith.constant 1.000000e+00 : f32
    %19 = vector.broadcast %cst_15 : f32 to vector<8x128xf32>
    %20 = arith.addf %18, %19 : vector<8x128xf32>
    %cst_16 = arith.constant 5.000000e-01 : f32
    %21 = vector.broadcast %cst_16 : f32 to vector<8x128xf32>
    %22 = arith.mulf %21, %20 : vector<8x128xf32>
    %23 = vector.broadcast %1 : vector<8x1xf32> to vector<8x128xf32>
    %24 = arith.mulf %22, %23 : vector<8x128xf32>
    %25 = vector.extract_strided_slice %7 {offsets = [0, 128], sizes = [8, 128], strides = [1, 1]} : vector<8x384xf32> to vector<8x128xf32>
    %26 = vector.extract_strided_slice %12 {offsets = [0, 128], sizes = [8, 128], strides = [1, 1]} : vector<8x384xf32> to vector<8x128xf32>
    %27 = arith.addf %25, %26 : vector<8x128xf32>
    %cst_17 = arith.constant 5.000000e-01 : f32
    %28 = vector.broadcast %cst_17 : f32 to vector<8x128xf32>
    %29 = arith.mulf %28, %27 : vector<8x128xf32>
    %30 = math.tanh %29 : vector<8x128xf32>
    %cst_18 = arith.constant 1.000000e+00 : f32
    %31 = vector.broadcast %cst_18 : f32 to vector<8x128xf32>
    %32 = arith.addf %30, %31 : vector<8x128xf32>
    %cst_19 = arith.constant 5.000000e-01 : f32
    %33 = vector.broadcast %cst_19 : f32 to vector<8x128xf32>
    %34 = arith.mulf %33, %32 : vector<8x128xf32>
    %35 = vector.extract_strided_slice %7 {offsets = [0, 256], sizes = [8, 128], strides = [1, 1]} : vector<8x384xf32> to vector<8x128xf32>
    %36 = vector.extract_strided_slice %12 {offsets = [0, 256], sizes = [8, 128], strides = [1, 1]} : vector<8x384xf32> to vector<8x128xf32>
    %37 = arith.mulf %34, %36 : vector<8x128xf32>
    %38 = arith.addf %35, %37 : vector<8x128xf32>
    %39 = math.tanh %38 : vector<8x128xf32>
    %cst_20 = arith.constant 1.000000e+00 : f32
    %40 = vector.broadcast %cst_20 : f32 to vector<8x128xf32>
    %41 = arith.subf %40, %24 : vector<8x128xf32>
    %42 = arith.mulf %41, %2 : vector<8x128xf32>
    %43 = arith.mulf %24, %39 : vector<8x128xf32>
    %44 = arith.addf %42, %43 : vector<8x128xf32>
    %c0_21 = arith.constant 0 : index
    %c0_22 = arith.constant 0 : index
    %45 = vector.load %arg8[%c0_21, %c0_22] : memref<8x128xf32, #tpu.memory_space<vmem>>, vector<8x128xf32>
    tpu.vector_store %arg8[%c0_21, %c0_22], %44 {strides = array<i32>} : memref<8x128xf32, #tpu.memory_space<vmem>>, vector<8x128xf32>,
    return
  }
  func.func @transform_0(%arg0: i32) -> (i32, i32) {
    %c0_i32 = arith.constant 0 : i32
    %c0_i32_0 = arith.constant 0 : i32
    return %arg0, %c0_i32 : i32, i32
  }
  func.func @transform_1(%arg0: i32) -> (i32, i32) {
    %c0_i32 = arith.constant 0 : i32
    %c0_i32_0 = arith.constant 0 : i32
    return %arg0, %c0_i32 : i32, i32
  }
  func.func @transform_2(%arg0: i32) -> (i32, i32) {
    %c0_i32 = arith.constant 0 : i32
    %c0_i32_0 = arith.constant 0 : i32
    return %arg0, %c0_i32 : i32, i32
  }
  func.func @transform_3(%arg0: i32) -> (i32, i32) {
    %c0_i32 = arith.constant 0 : i32
    %c0_i32_0 = arith.constant 0 : i32
    %c0_i32_1 = arith.constant 0 : i32
    return %c0_i32, %c0_i32_0 : i32, i32
  }
  func.func @transform_4(%arg0: i32) -> (i32, i32) {
    %c0_i32 = arith.constant 0 : i32
    %c0_i32_0 = arith.constant 0 : i32
    %c0_i32_1 = arith.constant 0 : i32
    return %c0_i32, %c0_i32_0 : i32, i32
  }
  func.func @transform_5(%arg0: i32) -> (i32, i32) {
    %c0_i32 = arith.constant 0 : i32
    %c0_i32_0 = arith.constant 0 : i32
    %c0_i32_1 = arith.constant 0 : i32
    return %c0_i32, %c0_i32_0 : i32, i32
  }
  func.func @transform_6(%arg0: i32) -> (i32, i32) {
    %c0_i32 = arith.constant 0 : i32
    %c0_i32_0 = arith.constant 0 : i32
    %c0_i32_1 = arith.constant 0 : i32
    return %c0_i32, %c0_i32_0 : i32, i32
  }
  func.func @transform_7(%arg0: i32) -> (i32, i32) {
    %c0_i32 = arith.constant 0 : i32
    %c0_i32_0 = arith.constant 0 : i32
    return %arg0, %c0_i32 : i32, i32
  }
}

</mosaic_0001>

<bundles_post_ra>
// kernel: tpu_custom_call.1
= control target key start
LH: loop header
LB: loop body
LE: loop exit
PB: predicated region body
PF: predicated region fallthrough
CT: control target
= control target key end

     0   :  { %12 = vsyncpa [#allocation3], 0  ;;  %s586_s0 = inlined_call_operand.hbm [shape: f32[2,4], index: 0, kind: input, shape index: {}]   ;;  %s587_s1 = inlined_call_operand.vmem [shape: f32[2,1], index: 1, kind: input, shape index: {}]   ;;  %s588_s2 = inlined_call_operand.hbm [shape: f32[2,128], index: 2, kind: input, shape index: {}]   ;;  %s589_s3 = inlined_call_operand.hbm [shape: f32[4,384], index: 3, kind: input, shape index: {}]   ;;  %s590_s4 = inlined_call_operand.vmem [shape: f32[1,384], index: 4, kind: input, shape index: {}]   ;;  %s591_s5 = inlined_call_operand.hbm [shape: f32[128,384], index: 5, kind: input, shape index: {}]   ;;  %s592_s6 = inlined_call_operand.vmem [shape: f32[1,384], index: 6, kind: input, shape index: {}]   ;;  %s593_s7 = inlined_call_operand.hbm [shape: f32[2,128], index: 7, kind: output, shape index: {}]  }
   0x1   :  { %13 = vsyncpa [#allocation6], 0 }
   0x2   :  { %14 = vsyncpa [#allocation9], 0 }
   0x3   :  { %15 = vsyncpa [#allocation4], 0 }
   0x4   :  { %19 = vsyncadd [#allocation3], 96  ;;  %s20_s26 = sshll.u32 %s586_s0, 4  ;;  %s492_s27 = smov [#allocation2]   ;;  %s21_s26 = int_to_ptr.hbm [resolvable:$true] %s20_s26 }
   0x5   :  { %s22_s28 = sshll.u32 %s492_s27, 4  ;;  %s493_s29 = smov 32   ;;  %s23_s28 = int_to_ptr.vmem [resolvable:$true] %s22_s28 }
   0x6   :  { %s494_s30 = smov 2  }
   0x7   :  { %28 = dma.hbm_to_vmem [thread:$0]  %s21_s26, 32, %s23_s28, [#allocation3], %s493_s29, %s493_s29, %s494_s30  }
   0x8   :  { %34 = vsyncadd [#allocation6], 96  ;;  %s35_s10 = sshll.u32 %s588_s2, 4  ;;  %s495_s11 = smov [#allocation5]   ;;  %s36_s10 = int_to_ptr.hbm [resolvable:$true] %s35_s10 }
   0x9   :  { %s37_s12 = sshll.u32 %s495_s11, 4  ;;  %s49_s14 = sshll.u32 %s589_s3, 4  ;;  %s38_s12 = int_to_ptr.vmem [resolvable:$true] %s37_s12  ;;  %s50_s14 = int_to_ptr.hbm [resolvable:$true] %s49_s14 }
   0xa   :  { %43 = dma.hbm_to_vmem [thread:$0]  %s36_s10, 32, %s38_s12, [#allocation6], %s493_s29, %s493_s29, %s494_s30  }
   0xb   :  { %s496_s15 = smov [#allocation7]   ;;  %s61_s19 = sshll.u32 %s591_s5, 4  ;;  %s62_s19 = int_to_ptr.hbm [resolvable:$true] %s61_s19 }
   0xc   :  { %s51_s16 = sshll.u32 %s496_s15, 4  ;;  %s497_s2 = smov [#allocation8]   ;;  %s52_s16 = int_to_ptr.vmem [resolvable:$true] %s51_s16 }
   0xd   :  { %54 = dma.hbm_to_vmem [thread:$0]  %s50_s14, 192, %s52_s16, [#allocation6]  }
   0xe   :  { %s63_s20 = sshll.u32 %s497_s2, 4  ;;  %s498_s21 = smov 384   ;;  %s64_s20 = int_to_ptr.vmem [resolvable:$true] %s63_s20 }
   0xf   :  { %s499_s22 = smov 24  }
  0x10   :  { %69 = dma.hbm_to_vmem [thread:$0]  %s62_s19, 6144, %s64_s20, [#allocation9], %s498_s21, %s498_s21, %s499_s22  }
  0x11   :  { %484 = dma.done.wait [#allocation3], 128  }
  0x12   :  { %485 = vsyncadd [#allocation3], 4294967168 }
  0x13   :  { %486 = dma.done.wait [#allocation6], 320  }
  0x14   :  { %487 = vsyncadd [#allocation6], 4294966976 }
  0x15   :  { %488 = dma.done.wait [#allocation9], 6144  }
  0x16   :  { %489 = vsyncadd [#allocation9], 4294961152  ;;  %v225_v0 = vld [vmem:[#allocation8 + $0x168] sm:$0xff]  ;;  %v226_v1 = vld [vmem:[#allocation8 + $0x170] sm:$0xff]  ;;  %v500_v16 = vmov 0   ;;  %vm113_vm0 = vcmask 1043456  }
  0x17   :  { %v222_v2 = vld [vmem:[#allocation8 + $0x150] sm:$0xff]  ;;  %236 = vmatpush.msra.mxu3 %v225_v0  ;;  %256 = vmatpush.msra.mxu0 %v226_v1  ;;  %v223_v3 = vld [vmem:[#allocation8 + $0x158] sm:$0xff]  ;;  %v220_v5 = vld [vmem:[#allocation8 + $0x140] sm:$0xff]  ;;  %vm109_vm1 = vcmask 31744  }
  0x18   :  { %v219_v4 = vld [vmem:[#allocation8 + $0x138] sm:$0xff]  ;;  %v216_v6 = vld [vmem:[#allocation8 + $0x120] sm:$0xff]  ;;  %v217_v7 = vld [vmem:[#allocation8 + $0x128] sm:$0xff]  ;;  %357 = vset.pattern.permute.xlu0 %v500_v16 }
  0x19   :  { %237 = vmatpush.msra.mxu3 %v222_v2  ;;  %257 = vmatpush.msra.mxu0 %v223_v3  ;;  %v227_v8 = vld [vmem:[#allocation8 + $0x178] sm:$0xff]  ;;  %v213_v10 = vld [vmem:[#allocation8 + $0x108] sm:$0xff]  ;;  %v214_v11 = vld [vmem:[#allocation8 + $0x110] sm:$0xff] }
  0x1a   :  { %v91_v9 = vld [vmem:[#allocation7] sm:$0xff]  ;;  %276 = vmatpush.msra.mxu1 %v227_v8  ;;  %v224_v12 = vld [vmem:[#allocation8 + $0x160] sm:$0xff]  ;;  %v221_v15 = vld [vmem:[#allocation8 + $0x148] sm:$0xff] }
  0x1b   :  { %238 = vmatpush.msra.mxu3 %v219_v4  ;;  %258 = vmatpush.msra.mxu0 %v220_v5  ;;  %103 = vst [vmem:[#allocation1] ss:$2 sm:$0xff] %v91_v9  ;;  %v210_v13 = vld [vmem:[#allocation8 + $0xf0] sm:$0xff]  ;;  %v211_v14 = vld [vmem:[#allocation8 + $0xf8] sm:$0xff]  ;;  %v208_v19 = vld [vmem:[#allocation8 + $0xe0] sm:$0xff] }
  0x1c   :  { %277 = vmatpush.msra.mxu1 %v224_v12  ;;  %v218_v17 = vld [vmem:[#allocation8 + $0x130] sm:$0xff]  ;;  %v207_v18 = vld [vmem:[#allocation8 + $0xd8] sm:$0xff]  ;;  %v204_v21 = vld [vmem:[#allocation8 + $0xc0] sm:$0xff] }
  0x1d   :  { %239 = vmatpush.msra.mxu3 %v216_v6  ;;  %259 = vmatpush.msra.mxu0 %v217_v7  ;;  %v215_v20 = vld [vmem:[#allocation8 + $0x118] sm:$0xff]  ;;  %v205_v22 = vld [vmem:[#allocation8 + $0xc8] sm:$0xff]  ;;  %v212_v25 = vld [vmem:[#allocation8 + $0x100] sm:$0xff] }
  0x1e   :  { %278 = vmatpush.msra.mxu1 %v221_v15  ;;  %v560_v24 = vld [vmem:[#allocation2] sm:$0xff]  ;;  %v202_v27 = vld [vmem:[#allocation8 + $0xb0] sm:$0xff]  ;;  %v199_v31 = vld [vmem:[#allocation8 + $0x98] sm:$0xff] }
  0x1f   :  { %240 = vmatpush.msra.mxu3 %v213_v10  ;;  %260 = vmatpush.msra.mxu0 %v214_v11  ;;  %v201_v26 = vld [vmem:[#allocation8 + $0xa8] sm:$0xff]  ;;  %v198_v30 = vld [vmem:[#allocation8 + $0x90] sm:$0xff]  ;;  %v92_v32 = vld [vmem:[#allocation7 + $0x8] sm:$0xf] }
  0x20   :  { %279 = vmatpush.msra.mxu1 %v218_v17  ;;  %v209_v29 = vld [vmem:[#allocation8 + $0xe8] sm:$0xff]  ;;  %v206_v33 = vld [vmem:[#allocation8 + $0xd0] sm:$0xff]  ;;  %105 = vst [vmem:[#allocation1 + $0x10] ss:$2 sm:$0xff] %v92_v32  ;;  %v195_v34 = vld [vmem:[#allocation8 + $0x78] sm:$0xff] }
  0x21   :  { %241 = vmatpush.msra.mxu3 %v210_v13  ;;  %261 = vmatpush.msra.mxu0 %v211_v14  ;;  %v196_v35 = vld [vmem:[#allocation8 + $0x80] sm:$0xff]  ;;  %v203_v37 = vld [vmem:[#allocation8 + $0xb8] sm:$0xff]  ;;  %v193_v39 = vld [vmem:[#allocation8 + $0x68] sm:$0xff] }
  0x22   :  { %v106_v23 = vld.sshfl [vmem:[#allocation1] sm:$0xff pattern:$0x75316420]  ;;  %280 = vmatpush.msra.mxu1 %v215_v20  ;;  %v107_v28 = vld.sshfl [vmem:[#allocation1 + $0x8] sm:$0xff pattern:$0x75316420] }
  0x23   :  { %242 = vmatpush.msra.mxu3 %v207_v18  ;;  %262 = vmatpush.msra.mxu0 %v208_v19  ;;  %v89_v36 = vld [vmem:[%s587_s1] sm:$0xff]  ;;  %v189_v41 = vld [vmem:[#allocation8 + $0x48] sm:$0xff]  ;;  %v190_v42 = vld [vmem:[#allocation8 + $0x50] sm:$0xff] }
  0x24   :  { %341 = vmatpush.msk.msra.mxu2 %vm113_vm0, %v106_v23  ;;  %281 = vmatpush.msra.mxu1 %v212_v25  ;;  %v192_v38 = vld [vmem:[#allocation8 + $0x60] sm:$0xff]  ;;  %v197_v43 = vld [vmem:[#allocation8 + $0x88] sm:$0xff]  ;;  %v186_v44 = vld [vmem:[#allocation8 + $0x30] sm:$0xff] }
  0x25   :  { %243 = vmatpush.msra.mxu3 %v204_v21  ;;  %263 = vmatpush.msra.mxu0 %v205_v22  ;;  %v200_v40 = vld [vmem:[#allocation8 + $0xa0] sm:$0xff]  ;;  %v187_v45 = vld [vmem:[#allocation8 + $0x38] sm:$0xff]  ;;  %v194_v47 = vld [vmem:[#allocation8 + $0x70] sm:$0xff] }
  0x26   :  { %342 = vmatmul.msk.f32.vlgmr.msra.gmra.mxu2 %vm109_vm1, %v560_v24  ;;  %282 = vmatpush.msra.mxu1 %v209_v29  ;;  %v183_v48 = vld [vmem:[#allocation8 + $0x18] sm:$0xff]  ;;  %v184_v49 = vld [vmem:[#allocation8 + $0x20] sm:$0xff]  ;;  %v181_v52 = vld [vmem:[#allocation8 + $0x8] sm:$0xff] }
  0x27   :  { %244 = vmatpush.msra.mxu3 %v201_v26  ;;  %264 = vmatpush.msra.mxu0 %v202_v27  ;;  %v108_v46 = vld.sshfl [vmem:[#allocation1 + $0x10] sm:$0xff pattern:$0x75316420]  ;;  %v191_v50 = vld [vmem:[#allocation8 + $0x58] sm:$0xff]  ;;  %v180_v51 = vld [vmem:[#allocation8] sm:$0xff] }
  0x28   :  { %343 = vmatpush.msk.msrb.mxu2 %vm113_vm0, %v107_v28  ;;  %283 = vmatpush.msra.mxu1 %v206_v33  ;;  %v90_v53 = vld [vmem:[#allocation5] sm:$0xff]  ;;  %v188_v54 = vld [vmem:[#allocation8 + $0x40] sm:$0xff]  ;;  %v93_v58 = vld [vmem:[%s590_s4] sm:$0x7] }
  0x29   :  { %245 = vmatpush.msra.mxu3 %v198_v30  ;;  %265 = vmatpush.msra.mxu0 %v199_v31  ;;  %v185_v55 = vld [vmem:[#allocation8 + $0x28] sm:$0xff]  ;;  %v182_v56 = vld [vmem:[#allocation8 + $0x10] sm:$0xff]  ;;  %v228_v59 = vld [vmem:[%s592_s6] sm:$0x7]  ;;  %v96_v60 = vperm.slane %v93_v58, 1  ;;  %v95_v2 = vperm.slane %v93_v58, 0 }
  0x2a   :  { %303 = vperm.xlu0 %357, %v89_v36   ;;  %284 = vmatpush.msra.mxu1 %v203_v37  ;;  %v231_v61 = vperm.slane %v228_v59, 1  ;;  %v230_v4 = vperm.slane %v228_v59, 0  ;;  %v232_v10 = vperm.slane %v228_v59, 2  ;;  %v97_v13 = vperm.slane %v93_v58, 2 }
  0x2b   :  { %246 = vmatpush.msra.mxu3 %v195_v34  ;;  %266 = vmatpush.msra.mxu0 %v196_v35 }
  0x2c   :  { %285 = vmatpush.msra.mxu1 %v200_v40  ;;  %345 = vmatpush.msk.msra.mxu2 %vm113_vm0, %v108_v46 }
  0x2d   :  { %247 = vmatpush.msra.mxu3 %v192_v38  ;;  %267 = vmatpush.msra.mxu0 %v193_v39 }
  0x2e   :  { %344 = vmatmul.msk.f32.vlgmr.msrb.gmra.mxu2 %vm109_vm1, %v560_v24  ;;  %286 = vmatpush.msra.mxu1 %v197_v43 }
  0x2f   :  { %248 = vmatpush.msra.mxu3 %v189_v41  ;;  %268 = vmatpush.msra.mxu0 %v190_v42 }
  0x30   :  { %287 = vmatpush.msra.mxu1 %v194_v47 }
  0x31   :  { %249 = vmatpush.msra.mxu3 %v186_v44  ;;  %269 = vmatpush.msra.mxu0 %v187_v45 }
  0x32   :  { %288 = vmatpush.msra.mxu1 %v191_v50 }
  0x33   :  { %250 = vmatpush.msra.mxu3 %v183_v48  ;;  %270 = vmatpush.msra.mxu0 %v184_v49 }
  0x34   :  { %289 = vmatpush.msra.mxu1 %v188_v54 }
  0x35   :  { %251 = vmatpush.msra.mxu3 %v180_v51  ;;  %271 = vmatpush.msra.mxu0 %v181_v52 }
  0x36   :  { %252 = vmatmul.f32.vlgmr.msra.gmra.mxu3 %v90_v53  ;;  %272 = vmatmul.f32.vlgmr.msra.gmra.mxu0 %v90_v53 }
  0x37   :  { %346 = vmatmul.msk.f32.vlgmr.msra.gmra.mxu2 %vm109_vm1, %v560_v24  ;;  %290 = vmatpush.msra.mxu1 %v185_v55 }
  0x39   :  { %291 = vmatpush.msra.mxu1 %v182_v56 }
  0x3a   :  { %292 = vmatmul.f32.vlgmr.msra.gmra.mxu1 %v90_v53 }
  0x9c   :  { %v304_v24 = vpop.permute.xlu0 %303 }
  0xa9   :  { %v137_v57 = vpop.f32.mrf.mxu2 }
  0xaa   :  { %v138_v7 = vadd.f32 %v137_v57, %v95_v2 }
  0xb1   :  { %v157_v62 = vpop.f32.mrf.mxu2 }
  0xb2   :  { %v158_v63 = vadd.f32 %v157_v62, %v96_v60 }
  0xb3   :  { %v273_v0 = vpop.f32.mrf.mxu0 }
  0xb4   :  { %v274_v1 = vadd.f32 %v273_v0, %v231_v61 }
  0xb6   :  { %v307_v3 = vadd.f32 %v274_v1, %v158_v63 }
  0xb7   :  { %v293_v12 = vpop.f32.mrf.mxu1 }
  0xb8   :  { %v308_v5 = vmul.f32 0.5, %v307_v3  ;;  %v294_v16 = vadd.f32 %v293_v12, %v232_v10 }
  0xb9   :  { %v253_v6 = vpop.f32.mrf.mxu3 }
  0xba   :  { %358 = vtanh.f32 %v308_v5  ;;  %v254_v8 = vadd.f32 %v253_v6, %v230_v4  ;;  %v177_v15 = vpop.f32.mrf.mxu2 }
  0xbb   :  { %v178_v19 = vadd.f32 %v177_v15, %v97_v13 }
  0xbc   :  { %v296_v9 = vadd.f32 %v254_v8, %v138_v7 }
  0xbe   :  { %v297_v11 = vmul.f32 0.5, %v296_v9 }
  0xc0   :  { %v359_v14 = vpop.eup %358  ;;  %360 = vtanh.f32 %v297_v11 }
  0xc1   :  { %v310_v17 = vadd.f32 1.0, %v359_v14 }
  0xc3   :  { %v311_v18 = vmul.f32 0.5, %v310_v17 }
  0xc5   :  { %v312_v20 = vmul.f32 %v311_v18, %v294_v16 }
  0xc6   :  { %v361_v21 = vpop.eup %360 }
  0xc7   :  { %v313_v22 = vadd.f32 %v312_v20, %v178_v19  ;;  %v299_v23 = vadd.f32 1.0, %v361_v21 }
  0xc9   :  { %362 = vtanh.f32 %v313_v22  ;;  %v300_v25 = vmul.f32 0.5, %v299_v23 }
  0xcb   :  { %v306_v26 = vmul.f32 %v304_v24, %v300_v25 }
  0xcd   :  { %v315_v27 = vsub.f32 1.0, %v306_v26 }
  0xcf   :  { %v363_v28 = vpop.eup %362  ;;  %v316_v29 = vmul.f32 %v315_v27, %v90_v53 }
  0xd0   :  { %v317_v30 = vmul.f32 %v363_v28, %v306_v26 }
  0xd2   :  { %v318_v31 = vadd.f32 %v317_v30, %v316_v29 }
  0xd4   :  { %319 = vst [vmem:[#allocation10] sm:$0xff] %v318_v31 }
  0xd5   :  { %323 = vsyncadd [#allocation4], 96  ;;  %s326_s26 = sshll.u32 %s593_s7, 4  ;;  %s501_s27 = smov [#allocation10]   ;;  %s327_s26 = int_to_ptr.hbm [resolvable:$true] %s326_s26 }
  0xd6   :  { %s324_s28 = sshll.u32 %s501_s27, 4  ;;  %s325_s28 = int_to_ptr.vmem [resolvable:$true] %s324_s28 }
  0xd7   :  { %332 = dma.vmem_to_hbm [thread:$0]  %s325_s28, 32, %s327_s26, [#allocation4], %s493_s29, %s493_s29, %s494_s30  }
  0xd8   :  { %490 = dma.done.wait [#allocation4], 128  }
  0xd9   :  { %491 = vsyncadd [#allocation4], 4294967168 }
  0xda   :  { %337 = vsyncpa [#allocation3], 1 }
  0xdb   :  { %338 = vsyncpa [#allocation6], 1 }
  0xdc   :  { %339 = vsyncpa [#allocation9], 1 }
  0xdd   :  { %340 = vsyncpa [#allocation4], 1 }

</bundles_post_ra>
